<compile_context>
chip_gen: v6e
topology: v6e:2x2x1
jax: 0.10.0
libtpu: 0.0.40
codegen_flags: <defaults>
</compile_context>

<pallas_src>
from functools import partial

import jax
import jax.numpy as jnp
from jax.experimental import pallas as pl
from jax.experimental.pallas import tpu as pltpu

EPS = 1e-5


def fused_double_conv_kernel(x_ref, pos_ref, w1_ref, b1_ref, g1_ref, bt1_ref,
                             w2_ref, b2_ref, g2_ref, bt2_ref, o_ref, *, L, K):
    """Two fused conv_blocks, everything in lane-dense (channels, N*L) layout.

    x_ref  : (C_in, N*L)    lane-dense input
    pos_ref: (1, N*L) int32 position l of each column within its sample
    w*_ref : (O, K*C_in)    conv weight flattened tap-major (row k*C + c)
    b*/g*/bt*_ref : (O, 1)  conv bias / BN gamma / BN beta
    o_ref  : (O, N*L)       lane-dense output
    """
    pos = pos_ref[...]
    pd = (K - 1) // 2

    def conv_bn_relu(xin, w_flat, b, g, bt):
        # xin: (Cin, NL); w_flat: (O, K*Cin); b, g, bt: (O, 1)
        Cin, NL = xin.shape
        taps = []
        for k in range(K):                       # static tap loop (K is tiny)
            s = k - pd                           # static shift
            if s == 0:
                xs = xin
            elif s > 0:
                xs = jnp.concatenate(
                    [xin[:, s:], jnp.zeros((Cin, s), xin.dtype)], axis=1)
            else:
                xs = jnp.concatenate(
                    [jnp.zeros((Cin, -s), xin.dtype), xin[:, :NL + s]], axis=1)
            # Implicit 'same' zero padding: zero lanes whose source position
            # falls outside [0, L) (also kills cross-sample bleed on the flat
            # N*L axis).
            valid = jnp.logical_and(pos + s >= 0, pos + s < L)
            taps.append(jnp.where(valid, xs, 0.0))
        rhs = jnp.concatenate(taps, axis=0)      # (K*Cin, NL) im2col block
        # Single MXU matmul per conv block, f32 accumulation.
        y = jnp.dot(w_flat, rhs, preferred_element_type=jnp.float32) + b
        # BatchNorm1d (training mode): per-channel stats over all N*L columns,
        # biased variance, eps=1e-5.
        mean = jnp.mean(y, axis=1, keepdims=True)
        var = jnp.mean((y - mean) ** 2, axis=1, keepdims=True)
        y = (y - mean) * jax.lax.rsqrt(var + EPS) * g + bt
        return jnp.maximum(y, 0.0)               # ReLU

    h = conv_bn_relu(x_ref[...].astype(jnp.float32),
                     w1_ref[...], b1_ref[...], g1_ref[...], bt1_ref[...])
    y = conv_bn_relu(h, w2_ref[...], b2_ref[...], g2_ref[...], bt2_ref[...])
    o_ref[...] = y.astype(o_ref.dtype)


def double_conv(x, params, *, ks=3):
    """DoubleConv.forward. x: (N, C, L) f32 -> (N, O, L)."""
    N, C, L = x.shape
    O = params["w1"].shape[0]
    NL = N * L
    K = ks

    # ---- layout plumbing only (no compute hoisted out of the kernel) ----
    # activations lane-dense: (N, C, L) -> (C, N*L), column index = n*L + l
    x2 = jnp.transpose(x, (1, 0, 2)).reshape(C, NL)
    # per-column position l within its sample (for in-kernel edge masking)
    pos = jnp.tile(jnp.arange(L, dtype=jnp.int32), N).reshape(1, NL)

    def flat_w(w):  # (O, C, K) -> (O, K*C), row index k*C + c  <->  w[o, c, k]
        return jnp.transpose(w, (0, 2, 1)).reshape(w.shape[0], K * w.shape[1])

    def col(v):
        return v.reshape(-1, 1)

    args = (
        x2, pos,
        flat_w(params["w1"]), col(params["b1"]),
        col(params["g1"]), col(params["bt1"]),
        flat_w(params["w2"]), col(params["b2"]),
        col(params["g2"]), col(params["bt2"]),
    )

    def full_spec(shape):
        return pl.BlockSpec(shape, lambda i, _n=len(shape): (0,) * _n)

    kern = partial(fused_double_conv_kernel, L=L, K=K)
    y2 = pl.pallas_call(
        kern,
        out_shape=jax.ShapeDtypeStruct((O, NL), x.dtype),
        # Single grid step: BN needs global (N, L) statistics and the whole
        # problem is VMEM resident at these sizes (see TODO above for tiling).
        grid=(1,),
        in_specs=[full_spec(a.shape) for a in args],
        out_specs=full_spec((O, NL)),
        compiler_params=pltpu.CompilerParams(
            dimension_semantics=("arbitrary",),
            vmem_limit_bytes=32 * 1024 * 1024,
        ),
    )(*args)

    # lane-dense (O, N*L) -> (N, O, L)
    return jnp.transpose(y2.reshape(O, N, L), (1, 0, 2))


def _ref_double_conv(x, params, *, ks=3):
    """Pure-JAX reference: Conv1d + BatchNorm1d(train) + ReLU, twice."""
    pd = (ks - 1) // 2

    def block(x, w, b, g, bt):
        y = jax.lax.conv_general_dilated(
            x, w, window_strides=(1,), padding=[(pd, pd)],
            dimension_numbers=("NCH", "OIH", "NCH"))
        y = y + b[None, :, None]
        mean = jnp.mean(y, axis=(0, 2), keepdims=True)
        var = jnp.mean((y - mean) ** 2, axis=(0, 2), keepdims=True)
        y = (y - mean) * jax.lax.rsqrt(var + EPS)
        y = y * g[None, :, None] + bt[None, :, None]
        return jnp.maximum(y, 0.0)

    y = block(x, params["w1"], params["b1"], params["g1"], params["bt1"])
    return block(y, params["w2"], params["b2"], params["g2"], params["bt2"])


def init_params(key, in_ch, out_ch, ks=3):
    k1, k2, k3, k4 = jax.random.split(key, 4)
    scale1 = 1.0 / jnp.sqrt(in_ch * ks)
    scale2 = 1.0 / jnp.sqrt(out_ch * ks)
    return {
        "w1": jax.random.normal(k1, (out_ch, in_ch, ks), jnp.float32) * scale1,
        "b1": jax.random.normal(k2, (out_ch,), jnp.float32) * scale1,
        "g1": jnp.ones((out_ch,), jnp.float32),    # BatchNorm default weight
        "bt1": jnp.zeros((out_ch,), jnp.float32),  # BatchNorm default bias
        "w2": jax.random.normal(k3, (out_ch, out_ch, ks), jnp.float32) * scale2,
        "b2": jax.random.normal(k4, (out_ch,), jnp.float32) * scale2,
        "g2": jnp.ones((out_ch,), jnp.float32),
        "bt2": jnp.zeros((out_ch,), jnp.float32),
    }


if __name__ == "__main__":
    N, C_IN, C_OUT, L, KS = 2, 4, 8, 16, 3

    key = jax.random.PRNGKey(0)
    k_param, k_x = jax.random.split(key)
    params = init_params(k_param, C_IN, C_OUT, KS)
    x = jax.random.normal(k_x, (N, C_IN, L), jnp.float32)

    out = jax.block_until_ready(double_conv(x, params, ks=KS))

    assert out.shape == (N, C_OUT, L), out.shape
    assert jnp.all(jnp.isfinite(out)), "non-finite output"
    assert jnp.all(out >= 0.0), "ReLU output must be non-negative"

    # Loose tolerance: both the kernel and the XLA reference run f32 matmul /
    # conv at the TPU's default (bf16-class) MXU precision, so only ~1e-2
    # agreement is expected; indexing/BN bugs would show up as O(1) errors.
    ref = jax.block_until_ready(_ref_double_conv(x, params, ks=KS))
    max_err = float(jnp.max(jnp.abs(out - ref)))
    assert max_err < 1e-1, f"mismatch vs reference: {max_err}"

    print("KERNEL_OK")
</pallas_src>

<mosaic_0001>
module attributes {stable_mosaic.version = 11 : i64} {
  func.func @fused_double_conv_kernel(%arg0: i32, %arg1: memref<4x32xf32, #tpu.memory_space<vmem>>, %arg2: memref<1x32xi32, #tpu.memory_space<vmem>>, %arg3: memref<8x12xf32, #tpu.memory_space<vmem>>, %arg4: memref<8x1xf32, #tpu.memory_space<vmem>>, %arg5: memref<8x1xf32, #tpu.memory_space<vmem>>, %arg6: memref<8x1xf32, #tpu.memory_space<vmem>>, %arg7: memref<8x24xf32, #tpu.memory_space<vmem>>, %arg8: memref<8x1xf32, #tpu.memory_space<vmem>>, %arg9: memref<8x1xf32, #tpu.memory_space<vmem>>, %arg10: memref<8x1xf32, #tpu.memory_space<vmem>>, %arg11: memref<8x32xf32, #tpu.memory_space<vmem>>) attributes {dimension_semantics = [#tpu.dimension_semantics<arbitrary>], iteration_bounds = array<i64: 1>, scalar_prefetch = 0 : i64, scratch_operands = 0 : i64, tpu.core_type = #tpu.core_type<tc>, window_params = [{pipeline_mode = #tpu.pipeline_mode<synchronous>, transform_indices = @transform_0, window_bounds = array<i64: 4, 32>}, {pipeline_mode = #tpu.pipeline_mode<synchronous>, transform_indices = @transform_1, window_bounds = array<i64: 1, 32>}, {pipeline_mode = #tpu.pipeline_mode<synchronous>, transform_indices = @transform_2, window_bounds = array<i64: 8, 12>}, {pipeline_mode = #tpu.pipeline_mode<synchronous>, transform_indices = @transform_3, window_bounds = array<i64: 8, 1>}, {pipeline_mode = #tpu.pipeline_mode<synchronous>, transform_indices = @transform_4, window_bounds = array<i64: 8, 1>}, {pipeline_mode = #tpu.pipeline_mode<synchronous>, transform_indices = @transform_5, window_bounds = array<i64: 8, 1>}, {pipeline_mode = #tpu.pipeline_mode<synchronous>, transform_indices = @transform_6, window_bounds = array<i64: 8, 24>}, {pipeline_mode = #tpu.pipeline_mode<synchronous>, transform_indices = @transform_7, window_bounds = array<i64: 8, 1>}, {pipeline_mode = #tpu.pipeline_mode<synchronous>, transform_indices = @transform_8, window_bounds = array<i64: 8, 1>}, {pipeline_mode = #tpu.pipeline_mode<synchronous>, transform_indices = @transform_9, window_bounds = array<i64: 8, 1>}, {pipeline_mode = #tpu.pipeline_mode<synchronous>, transform_indices = @transform_10, window_bounds = array<i64: 8, 32>}]} {
    %c0 = arith.constant 0 : index
    %c0_0 = arith.constant 0 : index
    %0 = vector.load %arg2[%c0, %c0_0] : memref<1x32xi32, #tpu.memory_space<vmem>>, vector<1x32xi32>
    %c0_1 = arith.constant 0 : index
    %c0_2 = arith.constant 0 : index
    %1 = vector.load %arg1[%c0_1, %c0_2] : memref<4x32xf32, #tpu.memory_space<vmem>>, vector<4x32xf32>
    %c0_3 = arith.constant 0 : index
    %c0_4 = arith.constant 0 : index
    %2 = vector.load %arg3[%c0_3, %c0_4] : memref<8x12xf32, #tpu.memory_space<vmem>>, vector<8x12xf32>
    %c0_5 = arith.constant 0 : index
    %c0_6 = arith.constant 0 : index
    %3 = vector.load %arg4[%c0_5, %c0_6] : memref<8x1xf32, #tpu.memory_space<vmem>>, vector<8x1xf32>
    %c0_7 = arith.constant 0 : index
    %c0_8 = arith.constant 0 : index
    %4 = vector.load %arg5[%c0_7, %c0_8] : memref<8x1xf32, #tpu.memory_space<vmem>>, vector<8x1xf32>
    %c0_9 = arith.constant 0 : index
    %c0_10 = arith.constant 0 : index
    %5 = vector.load %arg6[%c0_9, %c0_10] : memref<8x1xf32, #tpu.memory_space<vmem>>, vector<8x1xf32>
    %cst = arith.constant 0.000000e+00 : f32
    %6 = vector.broadcast %cst : f32 to vector<4x1xf32>
    %7 = vector.extract_strided_slice %1 {offsets = [0, 0], sizes = [4, 31], strides = [1, 1]} : vector<4x32xf32> to vector<4x31xf32>
    %8 = tpu.concatenate %6, %7 in 1 : vector<4x1xf32>, vector<4x31xf32> -> vector<4x32xf32>
    %c-1_i32 = arith.constant -1 : i32
    %9 = vector.broadcast %c-1_i32 : i32 to vector<1x32xi32>
    %10 = arith.addi %0, %9 : vector<1x32xi32>
    %c0_i32 = arith.constant 0 : i32
    %11 = vector.broadcast %c0_i32 : i32 to vector<1x32xi32>
    %12 = arith.cmpi sge, %10, %11 : vector<1x32xi32>
    %c-1_i32_11 = arith.constant -1 : i32
    %13 = vector.broadcast %c-1_i32_11 : i32 to vector<1x32xi32>
    %14 = arith.addi %0, %13 : vector<1x32xi32>
    %c16_i32 = arith.constant 16 : i32
    %15 = vector.broadcast %c16_i32 : i32 to vector<1x32xi32>
    %16 = arith.cmpi slt, %14, %15 : vector<1x32xi32>
    %17 = arith.andi %12, %16 : vector<1x32xi1>
    %cst_12 = arith.constant 0.000000e+00 : f32
    %18 = vector.shape_cast %17 : vector<1x32xi1> to vector<1x32xi1>
    %19 = vector.broadcast %18 : vector<1x32xi1> to vector<4x32xi1>
    %20 = vector.broadcast %cst_12 : f32 to vector<4x32xf32>
    %21 = arith.select %19, %8, %20 : vector<4x32xi1>, vector<4x32xf32>
    %c0_i32_13 = arith.constant 0 : i32
    %22 = vector.broadcast %c0_i32_13 : i32 to vector<1x32xi32>
    %23 = arith.addi %0, %22 : vector<1x32xi32>
    %c0_i32_14 = arith.constant 0 : i32
    %24 = vector.broadcast %c0_i32_14 : i32 to vector<1x32xi32>
    %25 = arith.cmpi sge, %23, %24 : vector<1x32xi32>
    %c0_i32_15 = arith.constant 0 : i32
    %26 = vector.broadcast %c0_i32_15 : i32 to vector<1x32xi32>
    %27 = arith.addi %0, %26 : vector<1x32xi32>
    %c16_i32_16 = arith.constant 16 : i32
    %28 = vector.broadcast %c16_i32_16 : i32 to vector<1x32xi32>
    %29 = arith.cmpi slt, %27, %28 : vector<1x32xi32>
    %30 = arith.andi %25, %29 : vector<1x32xi1>
    %cst_17 = arith.constant 0.000000e+00 : f32
    %31 = vector.shape_cast %30 : vector<1x32xi1> to vector<1x32xi1>
    %32 = vector.broadcast %31 : vector<1x32xi1> to vector<4x32xi1>
    %33 = vector.broadcast %cst_17 : f32 to vector<4x32xf32>
    %34 = arith.select %32, %1, %33 : vector<4x32xi1>, vector<4x32xf32>
    %35 = vector.extract_strided_slice %1 {offsets = [0, 1], sizes = [4, 31], strides = [1, 1]} : vector<4x32xf32> to vector<4x31xf32>
    %cst_18 = arith.constant 0.000000e+00 : f32
    %36 = vector.broadcast %cst_18 : f32 to vector<4x1xf32>
    %37 = tpu.concatenate %35, %36 in 1 : vector<4x31xf32>, vector<4x1xf32> -> vector<4x32xf32>
    %c1_i32 = arith.constant 1 : i32
    %38 = vector.broadcast %c1_i32 : i32 to vector<1x32xi32>
    %39 = arith.addi %0, %38 : vector<1x32xi32>
    %c0_i32_19 = arith.constant 0 : i32
    %40 = vector.broadcast %c0_i32_19 : i32 to vector<1x32xi32>
    %41 = arith.cmpi sge, %39, %40 : vector<1x32xi32>
    %c1_i32_20 = arith.constant 1 : i32
    %42 = vector.broadcast %c1_i32_20 : i32 to vector<1x32xi32>
    %43 = arith.addi %0, %42 : vector<1x32xi32>
    %c16_i32_21 = arith.constant 16 : i32
    %44 = vector.broadcast %c16_i32_21 : i32 to vector<1x32xi32>
    %45 = arith.cmpi slt, %43, %44 : vector<1x32xi32>
    %46 = arith.andi %41, %45 : vector<1x32xi1>
    %cst_22 = arith.constant 0.000000e+00 : f32
    %47 = vector.shape_cast %46 : vector<1x32xi1> to vector<1x32xi1>
    %48 = vector.broadcast %47 : vector<1x32xi1> to vector<4x32xi1>
    %49 = vector.broadcast %cst_22 : f32 to vector<4x32xf32>
    %50 = arith.select %48, %37, %49 : vector<4x32xi1>, vector<4x32xf32>
    %51 = tpu.concatenate %21, %34, %50 in 0 : vector<4x32xf32>, vector<4x32xf32>, vector<4x32xf32> -> vector<12x32xf32>
    %cst_23 = arith.constant dense<0.000000e+00> : vector<8x32xf32>
    %52 = tpu.matmul %2, %51, %cst_23 {dimension_numbers = #tpu.dot_dimension_numbers<[1], [0], [0], [1], [0, 0, 1, 1], [], []>} : vector<8x12xf32>, vector<12x32xf32>, vector<8x32xf32> -> vector<8x32xf32>
    %53 = vector.broadcast %3 : vector<8x1xf32> to vector<8x32xf32>
    %54 = arith.addf %52, %53 : vector<8x32xf32>
    %cst_24 = arith.constant dense<0.000000e+00> : vector<8xf32>
    %55 = vector.multi_reduction <add>, %54, %cst_24 [1] : vector<8x32xf32> to vector<8xf32>
    %56 = vector.shape_cast %55 : vector<8xf32> to vector<8x1xf32>
    %cst_25 = arith.constant 3.200000e+01 : f32
    %57 = vector.broadcast %cst_25 : f32 to vector<8x1xf32>
    %58 = arith.divf %56, %57 : vector<8x1xf32>
    %59 = vector.broadcast %58 : vector<8x1xf32> to vector<8x32xf32>
    %60 = arith.subf %54, %59 : vector<8x32xf32>
    %61 = arith.mulf %60, %60 : vector<8x32xf32>
    %cst_26 = arith.constant dense<0.000000e+00> : vector<8xf32>
    %62 = vector.multi_reduction <add>, %61, %cst_26 [1] : vector<8x32xf32> to vector<8xf32>
    %63 = vector.shape_cast %62 : vector<8xf32> to vector<8x1xf32>
    %cst_27 = arith.constant 3.200000e+01 : f32
    %64 = vector.broadcast %cst_27 : f32 to vector<8x1xf32>
    %65 = arith.divf %63, %64 : vector<8x1xf32>
    %66 = vector.broadcast %58 : vector<8x1xf32> to vector<8x32xf32>
    %67 = arith.subf %54, %66 : vector<8x32xf32>
    %cst_28 = arith.constant 9.99999974E-6 : f32
    %68 = vector.broadcast %cst_28 : f32 to vector<8x1xf32>
    %69 = arith.addf %65, %68 : vector<8x1xf32>
    %70 = math.rsqrt %69 : vector<8x1xf32>
    %71 = vector.broadcast %70 : vector<8x1xf32> to vector<8x32xf32>
    %72 = arith.mulf %67, %71 : vector<8x32xf32>
    %73 = vector.broadcast %4 : vector<8x1xf32> to vector<8x32xf32>
    %74 = arith.mulf %72, %73 : vector<8x32xf32>
    %75 = vector.broadcast %5 : vector<8x1xf32> to vector<8x32xf32>
    %76 = arith.addf %74, %75 : vector<8x32xf32>
    %cst_29 = arith.constant 0.000000e+00 : f32
    %77 = vector.broadcast %cst_29 : f32 to vector<8x32xf32>
    %78 = arith.maximumf %76, %77 : vector<8x32xf32>
    %c0_30 = arith.constant 0 : index
    %c0_31 = arith.constant 0 : index
    %79 = vector.load %arg7[%c0_30, %c0_31] : memref<8x24xf32, #tpu.memory_space<vmem>>, vector<8x24xf32>
    %c0_32 = arith.constant 0 : index
    %c0_33 = arith.constant 0 : index
    %80 = vector.load %arg8[%c0_32, %c0_33] : memref<8x1xf32, #tpu.memory_space<vmem>>, vector<8x1xf32>
    %c0_34 = arith.constant 0 : index
    %c0_35 = arith.constant 0 : index
    %81 = vector.load %arg9[%c0_34, %c0_35] : memref<8x1xf32, #tpu.memory_space<vmem>>, vector<8x1xf32>
    %c0_36 = arith.constant 0 : index
    %c0_37 = arith.constant 0 : index
    %82 = vector.load %arg10[%c0_36, %c0_37] : memref<8x1xf32, #tpu.memory_space<vmem>>, vector<8x1xf32>
    %cst_38 = arith.constant 0.000000e+00 : f32
    %83 = vector.broadcast %cst_38 : f32 to vector<8x1xf32>
    %84 = vector.extract_strided_slice %78 {offsets = [0, 0], sizes = [8, 31], strides = [1, 1]} : vector<8x32xf32> to vector<8x31xf32>
    %85 = tpu.concatenate %83, %84 in 1 : vector<8x1xf32>, vector<8x31xf32> -> vector<8x32xf32>
    %c-1_i32_39 = arith.constant -1 : i32
    %86 = vector.broadcast %c-1_i32_39 : i32 to vector<1x32xi32>
    %87 = arith.addi %0, %86 : vector<1x32xi32>
    %c0_i32_40 = arith.constant 0 : i32
    %88 = vector.broadcast %c0_i32_40 : i32 to vector<1x32xi32>
    %89 = arith.cmpi sge, %87, %88 : vector<1x32xi32>
    %c-1_i32_41 = arith.constant -1 : i32
    %90 = vector.broadcast %c-1_i32_41 : i32 to vector<1x32xi32>
    %91 = arith.addi %0, %90 : vector<1x32xi32>
    %c16_i32_42 = arith.constant 16 : i32
    %92 = vector.broadcast %c16_i32_42 : i32 to vector<1x32xi32>
    %93 = arith.cmpi slt, %91, %92 : vector<1x32xi32>
    %94 = arith.andi %89, %93 : vector<1x32xi1>
    %cst_43 = arith.constant 0.000000e+00 : f32
    %95 = vector.shape_cast %94 : vector<1x32xi1> to vector<1x32xi1>
    %96 = vector.broadcast %95 : vector<1x32xi1> to vector<8x32xi1>
    %97 = vector.broadcast %cst_43 : f32 to vector<8x32xf32>
    %98 = arith.select %96, %85, %97 : vector<8x32xi1>, vector<8x32xf32>
    %c0_i32_44 = arith.constant 0 : i32
    %99 = vector.broadcast %c0_i32_44 : i32 to vector<1x32xi32>
    %100 = arith.addi %0, %99 : vector<1x32xi32>
    %c0_i32_45 = arith.constant 0 : i32
    %101 = vector.broadcast %c0_i32_45 : i32 to vector<1x32xi32>
    %102 = arith.cmpi sge, %100, %101 : vector<1x32xi32>
    %c0_i32_46 = arith.constant 0 : i32
    %103 = vector.broadcast %c0_i32_46 : i32 to vector<1x32xi32>
    %104 = arith.addi %0, %103 : vector<1x32xi32>
    %c16_i32_47 = arith.constant 16 : i32
    %105 = vector.broadcast %c16_i32_47 : i32 to vector<1x32xi32>
    %106 = arith.cmpi slt, %104, %105 : vector<1x32xi32>
    %107 = arith.andi %102, %106 : vector<1x32xi1>
    %cst_48 = arith.constant 0.000000e+00 : f32
    %108 = vector.shape_cast %107 : vector<1x32xi1> to vector<1x32xi1>
    %109 = vector.broadcast %108 : vector<1x32xi1> to vector<8x32xi1>
    %110 = vector.broadcast %cst_48 : f32 to vector<8x32xf32>
    %111 = arith.select %109, %78, %110 : vector<8x32xi1>, vector<8x32xf32>
    %112 = vector.extract_strided_slice %78 {offsets = [0, 1], sizes = [8, 31], strides = [1, 1]} : vector<8x32xf32> to vector<8x31xf32>
    %cst_49 = arith.constant 0.000000e+00 : f32
    %113 = vector.broadcast %cst_49 : f32 to vector<8x1xf32>
    %114 = tpu.concatenate %112, %113 in 1 : vector<8x31xf32>, vector<8x1xf32> -> vector<8x32xf32>
    %c1_i32_50 = arith.constant 1 : i32
    %115 = vector.broadcast %c1_i32_50 : i32 to vector<1x32xi32>
    %116 = arith.addi %0, %115 : vector<1x32xi32>
    %c0_i32_51 = arith.constant 0 : i32
    %117 = vector.broadcast %c0_i32_51 : i32 to vector<1x32xi32>
    %118 = arith.cmpi sge, %116, %117 : vector<1x32xi32>
    %c1_i32_52 = arith.constant 1 : i32
    %119 = vector.broadcast %c1_i32_52 : i32 to vector<1x32xi32>
    %120 = arith.addi %0, %119 : vector<1x32xi32>
    %c16_i32_53 = arith.constant 16 : i32
    %121 = vector.broadcast %c16_i32_53 : i32 to vector<1x32xi32>
    %122 = arith.cmpi slt, %120, %121 : vector<1x32xi32>
    %123 = arith.andi %118, %122 : vector<1x32xi1>
    %cst_54 = arith.constant 0.000000e+00 : f32
    %124 = vector.shape_cast %123 : vector<1x32xi1> to vector<1x32xi1>
    %125 = vector.broadcast %124 : vector<1x32xi1> to vector<8x32xi1>
    %126 = vector.broadcast %cst_54 : f32 to vector<8x32xf32>
    %127 = arith.select %125, %114, %126 : vector<8x32xi1>, vector<8x32xf32>
    %128 = tpu.concatenate %98, %111, %127 in 0 : vector<8x32xf32>, vector<8x32xf32>, vector<8x32xf32> -> vector<24x32xf32>
    %cst_55 = arith.constant dense<0.000000e+00> : vector<8x32xf32>
    %129 = tpu.matmul %79, %128, %cst_55 {dimension_numbers = #tpu.dot_dimension_numbers<[1], [0], [0], [1], [0, 0, 1, 1], [], []>} : vector<8x24xf32>, vector<24x32xf32>, vector<8x32xf32> -> vector<8x32xf32>
    %130 = vector.broadcast %80 : vector<8x1xf32> to vector<8x32xf32>
    %131 = arith.addf %129, %130 : vector<8x32xf32>
    %cst_56 = arith.constant dense<0.000000e+00> : vector<8xf32>
    %132 = vector.multi_reduction <add>, %131, %cst_56 [1] : vector<8x32xf32> to vector<8xf32>
    %133 = vector.shape_cast %132 : vector<8xf32> to vector<8x1xf32>
    %cst_57 = arith.constant 3.200000e+01 : f32
    %134 = vector.broadcast %cst_57 : f32 to vector<8x1xf32>
    %135 = arith.divf %133, %134 : vector<8x1xf32>
    %136 = vector.broadcast %135 : vector<8x1xf32> to vector<8x32xf32>
    %137 = arith.subf %131, %136 : vector<8x32xf32>
    %138 = arith.mulf %137, %137 : vector<8x32xf32>
    %cst_58 = arith.constant dense<0.000000e+00> : vector<8xf32>
    %139 = vector.multi_reduction <add>, %138, %cst_58 [1] : vector<8x32xf32> to vector<8xf32>
    %140 = vector.shape_cast %139 : vector<8xf32> to vector<8x1xf32>
    %cst_59 = arith.constant 3.200000e+01 : f32
    %141 = vector.broadcast %cst_59 : f32 to vector<8x1xf32>
    %142 = arith.divf %140, %141 : vector<8x1xf32>
    %143 = vector.broadcast %135 : vector<8x1xf32> to vector<8x32xf32>
    %144 = arith.subf %131, %143 : vector<8x32xf32>
    %cst_60 = arith.constant 9.99999974E-6 : f32
    %145 = vector.broadcast %cst_60 : f32 to vector<8x1xf32>
    %146 = arith.addf %142, %145 : vector<8x1xf32>
    %147 = math.rsqrt %146 : vector<8x1xf32>
    %148 = vector.broadcast %147 : vector<8x1xf32> to vector<8x32xf32>
    %149 = arith.mulf %144, %148 : vector<8x32xf32>
    %150 = vector.broadcast %81 : vector<8x1xf32> to vector<8x32xf32>
    %151 = arith.mulf %149, %150 : vector<8x32xf32>
    %152 = vector.broadcast %82 : vector<8x1xf32> to vector<8x32xf32>
    %153 = arith.addf %151, %152 : vector<8x32xf32>
    %cst_61 = arith.constant 0.000000e+00 : f32
    %154 = vector.broadcast %cst_61 : f32 to vector<8x32xf32>
    %155 = arith.maximumf %153, %154 : vector<8x32xf32>
    %c0_62 = arith.constant 0 : index
    %c0_63 = arith.constant 0 : index
    %156 = vector.load %arg11[%c0_62, %c0_63] : memref<8x32xf32, #tpu.memory_space<vmem>>, vector<8x32xf32>
    tpu.vector_store %arg11[%c0_62, %c0_63], %155 {strides = array<i32>} : memref<8x32xf32, #tpu.memory_space<vmem>>, vector<8x32xf32>,
    return
  }
  func.func @transform_0(%arg0: i32) -> (i32, i32) {
    %c0_i32 = arith.constant 0 : i32
    %c0_i32_0 = arith.constant 0 : i32
    %c0_i32_1 = arith.constant 0 : i32
    return %c0_i32, %c0_i32_0 : i32, i32
  }
  func.func @transform_1(%arg0: i32) -> (i32, i32) {
    %c0_i32 = arith.constant 0 : i32
    %c0_i32_0 = arith.constant 0 : i32
    %c0_i32_1 = arith.constant 0 : i32
    return %c0_i32, %c0_i32_0 : i32, i32
  }
  func.func @transform_2(%arg0: i32) -> (i32, i32) {
    %c0_i32 = arith.constant 0 : i32
    %c0_i32_0 = arith.constant 0 : i32
    %c0_i32_1 = arith.constant 0 : i32
    return %c0_i32, %c0_i32_0 : i32, i32
  }
  func.func @transform_3(%arg0: i32) -> (i32, i32) {
    %c0_i32 = arith.constant 0 : i32
    %c0_i32_0 = arith.constant 0 : i32
    %c0_i32_1 = arith.constant 0 : i32
    return %c0_i32, %c0_i32_0 : i32, i32
  }
  func.func @transform_4(%arg0: i32) -> (i32, i32) {
    %c0_i32 = arith.constant 0 : i32
    %c0_i32_0 = arith.constant 0 : i32
    %c0_i32_1 = arith.constant 0 : i32
    return %c0_i32, %c0_i32_0 : i32, i32
  }
  func.func @transform_5(%arg0: i32) -> (i32, i32) {
    %c0_i32 = arith.constant 0 : i32
    %c0_i32_0 = arith.constant 0 : i32
    %c0_i32_1 = arith.constant 0 : i32
    return %c0_i32, %c0_i32_0 : i32, i32
  }
  func.func @transform_6(%arg0: i32) -> (i32, i32) {
    %c0_i32 = arith.constant 0 : i32
    %c0_i32_0 = arith.constant 0 : i32
    %c0_i32_1 = arith.constant 0 : i32
    return %c0_i32, %c0_i32_0 : i32, i32
  }
  func.func @transform_7(%arg0: i32) -> (i32, i32) {
    %c0_i32 = arith.constant 0 : i32
    %c0_i32_0 = arith.constant 0 : i32
    %c0_i32_1 = arith.constant 0 : i32
    return %c0_i32, %c0_i32_0 : i32, i32
  }
  func.func @transform_8(%arg0: i32) -> (i32, i32) {
    %c0_i32 = arith.constant 0 : i32
    %c0_i32_0 = arith.constant 0 : i32
    %c0_i32_1 = arith.constant 0 : i32
    return %c0_i32, %c0_i32_0 : i32, i32
  }
  func.func @transform_9(%arg0: i32) -> (i32, i32) {
    %c0_i32 = arith.constant 0 : i32
    %c0_i32_0 = arith.constant 0 : i32
    %c0_i32_1 = arith.constant 0 : i32
    return %c0_i32, %c0_i32_0 : i32, i32
  }
  func.func @transform_10(%arg0: i32) -> (i32, i32) {
    %c0_i32 = arith.constant 0 : i32
    %c0_i32_0 = arith.constant 0 : i32
    %c0_i32_1 = arith.constant 0 : i32
    return %c0_i32, %c0_i32_0 : i32, i32
  }
}

</mosaic_0001>

<bundles_post_ra>
// kernel: tpu_custom_call.1
= control target key start
LH: loop header
LB: loop body
LE: loop exit
PB: predicated region body
PF: predicated region fallthrough
CT: control target
= control target key end

     0   :  { %s399_s15 = smov 127   ;;  %v400_v1 = vmov 0   ;;  %v401_v3 = vmov 0.0   ;;  %s537_s0 = inlined_call_operand.vmem [shape: f32[4,32], index: 0, kind: input, shape index: {}]   ;;  %s538_s1 = inlined_call_operand.vmem [shape: s32[1,32], index: 1, kind: input, shape index: {}]   ;;  %s539_s2 = inlined_call_operand.vmem [shape: f32[8,12], index: 2, kind: input, shape index: {}]   ;;  %s540_s3 = inlined_call_operand.vmem [shape: f32[8,1], index: 3, kind: input, shape index: {}]   ;;  %s541_s4 = inlined_call_operand.vmem [shape: f32[8,1], index: 4, kind: input, shape index: {}]   ;;  %s542_s5 = inlined_call_operand.vmem [shape: f32[8,1], index: 5, kind: input, shape index: {}]   ;;  %s543_s6 = inlined_call_operand.vmem [shape: f32[8,24], index: 6, kind: input, shape index: {}]   ;;  %s544_s7 = inlined_call_operand.vmem [shape: f32[8,1], index: 7, kind: input, shape index: {}]   ;;  %s545_s8 = inlined_call_operand.vmem [shape: f32[8,1], index: 8, kind: input, shape index: {}]   ;;  %s546_s9 = inlined_call_operand.vmem [shape: f32[8,1], index: 9, kind: input, shape index: {}]   ;;  %s547_s10 = inlined_call_operand.hbm [shape: f32[8,32], index: 10, kind: output, shape index: {}]  }
   0x1   :  { %v37_v0 = vld [vmem:[%s537_s0] sm:$0xf]  ;;  %371 = vset.pattern.permute.xlu1 %v400_v1  ;;  %372 = vset.pattern.permute.xlu0 %v400_v1 }
   0x2   :  { %69 = vrot.lane.b32.xlu0 %v37_v0, %s399_s15  ;;  %v39_v2 = vld [vmem:[%s540_s3] sm:$0xff]  ;;  %349 = vmatprep.subr.mxu0 %v401_v3 }
   0x3   :  { %92 = vperm.xlu1 %371, %v39_v2  }
   0x4   :  { %15 = vsyncpa [#allocation3], 0  ;;  %356 = vmatprep.subr.mxu1 %v401_v3  ;;  %s402_s18 = smov 1   ;;  %vm403_vm0 = vmmov 0   ;;  %v36_v4 = vld [vmem:[%s538_s1] sm:$0x1]  ;;  %v53_v6 = vlaneseq }
   0x5   :  { %353 = vmatprep.mubr.msk.f32.mxu0 %vm403_vm0, %v401_v3  ;;  %362 = vmatprep.mubr.msk.f32.mxu1 %vm403_vm0, %v401_v3  ;;  %v74_v5 = vadd.s32 1, %v36_v4  ;;  %vm59_vm1 = vcmp.ge.s32.totalorder %v36_v4, 0  ;;  %vm60_vm2 = vcmp.lt.s32.totalorder %v36_v4, 16  ;;  %v48_v7 = vadd.s32 4294967295, %v36_v4  ;;  %v38_v27 = vld [vmem:[%s539_s2] sm:$0xff] }
   0x6   :  { %43 = vrot.lane.b32.xlu0 %v37_v0, %s402_s18  ;;  %v54_v8 = vshrl.u32 %v53_v6, 7  ;;  %vm61_vm5 = vmand %vm59_vm1, %vm60_vm2  ;;  %vm72_vm11 = vcmask 252928   ;;  %vm88_vm13 = vcmask 1043456   ;;  %vm46_vm14 = vcmask 7168   ;;  %v41_v34 = vld [vmem:[%s542_s5] sm:$0xff] }
   0x7   :  { %vm75_vm3 = vcmp.ge.s32.totalorder %v74_v5, 0  ;;  %vm76_vm4 = vcmp.lt.s32.totalorder %v74_v5, 16  ;;  %v62_v9 = vsel %vm61_vm5, 1, %v400_v1  ;;  %vm49_vm7 = vcmp.ge.s32.totalorder %v48_v7, 0  ;;  %v40_v40 = vld [vmem:[%s541_s4] sm:$0xff] }
   0x8   :  { %vm77_vm6 = vmand %vm75_vm3, %vm76_vm4  ;;  %vm50_vm8 = vcmp.lt.s32.totalorder %v48_v7, 16  ;;  %v55_v10 = vsub.s32 0, %v54_v8  ;;  %vm95_vm0 = vcmask 97280   ;;  %vm172_vm1 = vcmask 261120   ;;  %v201_v51 = vld [vmem:[%s544_s7] sm:$0xff] }
   0x9   :  { %v78_v11 = vsel %vm77_vm6, 1, %v400_v1  ;;  %vm51_vm9 = vmand %vm49_vm7, %vm50_vm8  ;;  %v200_v55 = vld [vmem:[%s543_s6] sm:$0xff]  ;;  %vm221_vm2 = vcmask 195584  }
   0xa   :  { %v66_v12 = vrot.slane %v62_v9, %v55_v10  ;;  %v82_v13 = vrot.slane %v78_v11, %v55_v10  ;;  %v52_v14 = vsel %vm51_vm9, 1, %v400_v1  ;;  %v202_v62 = vld [vmem:[%s545_s8] sm:$0xff]  ;;  %s404_s8 = smov [#allocation2]  }
   0xb   :  { %v56_v17 = vrot.slane %v52_v14, %v55_v10  ;;  %v203_v4 = vld [vmem:[%s546_s9] sm:$0xff]  ;;  %s328_s27 = sshll.u32 %s404_s8, 4  ;;  %s329_s27 = int_to_ptr.vmem [resolvable:$true] %s328_s27 }
   0xc   :  { %vm475_vm10 = vcmp.eq.s32.totalorder %v66_v12, 1  ;;  %vm479_vm12 = vcmp.eq.s32.totalorder %v82_v13, 1  ;;  %s377_s28 = scalar_lea.vmem %s329_s27, 128  ;;  %p382_p1 = scmp.lt.s32.totalorder %s329_s27, %s329_s27 }
   0xd   :  { %v68_v18 = vsel %vm475_vm10, %v37_v0, 0.0  ;;  %vm488_vm15 = vcmp.eq.s32.totalorder %v56_v17, 1  ;;  %p378_p0 = scmp.ne.s32.totalorder %s329_s27, %s377_s28  ;;  %p383_p2 = scmp.lt.s32.totalorder %s377_s28, %s377_s28 }
   0xe   :  { %v86_v22 = vrot.slane %v68_v18, 4 }
   0xf   :  { %p384_p3 = por %p383_p2, %p382_p1 }
  0x11   :  { %p385_p4 = pnand %p384_p3, %p378_p0 }
  0x74   :  { %v70_v19 = vpop.permute.xlu0 %69 }
  0x75   :  { %v73_v20 = vsel %vm72_vm11, %v70_v19, 0.0 }
  0x76   :  { %v84_v21 = vsel %vm479_vm12, %v73_v20, 0.0 }
  0x77   :  { %350 = vmatpush3.msk.msra.mxu0 %vm88_vm13, %v84_v21 }
  0x78   :  { %v44_v24 = vpop.permute.xlu0 %43  ;;  %351 = vmatprep.subr.mxu0 %v401_v3 }
  0x79   :  { %v47_v25 = vsel %vm46_vm14, 0.0, %v44_v24 }
  0x7a   :  { %v58_v26 = vsel %vm488_vm15, %v47_v25, 0.0 }
  0x7b   :  { %v89_v28 = vsel %vm88_vm13, %v58_v26, %v86_v22 }
  0x7c   :  { %352 = vmatpush3.msra.mxu0 %v89_v28 }
  0x7d   :  { %354 = vmatmul.mubr.msk.f32.vlgmr.msra.gmra.mxu0 %vm95_vm0, %v38_v27 }
  0x7e   :  { %v93_v29 = vpop.permute.xlu1 %92 }
 0x13d   :  { %v168_v30 = vpop.f32.mrf.mxu0 }
 0x13e   :  { %v169_v31 = vadd.f32 %v168_v30, %v93_v29 }
 0x13f   :  { %v355_v32 = vpop.f32.mrf.mxu0 }
 0x140   :  { %v173_v33 = vsel %vm172_vm1, %v169_v31, 0.0 }
 0x141   :  { %174 = vadd.xlane.f32.xlu1 %v173_v33 }
 0x152   :  { %195 = vperm.xlu1 %371, %v41_v34  }
 0x1ca   :  { %v175_v35 = vpop.xlane.xlu1 %174 }
 0x1cb   :  { %v177_v36 = vmul.f32 0.03125, %v175_v35 }
 0x1cd   :  { %v178_v37 = vsub.f32 %v169_v31, %v177_v36 }
 0x1ce   :  { %v196_v48 = vpop.permute.xlu1 %195 }
 0x1cf   :  { %v179_v38 = vmul.f32 %v178_v37, %v178_v37 }
 0x1d1   :  { %v180_v39 = vsel %vm172_vm1, %v179_v38, 0.0 }
 0x1d2   :  { %181 = vadd.xlane.f32.xlu0 %v180_v39 }
 0x1e8   :  { %189 = vperm.xlu0 %372, %v40_v40  }
 0x25b   :  { %v182_v41 = vpop.xlane.xlu0 %181 }
 0x25c   :  { %v183_v42 = vmul.f32 0.03125, %v182_v41 }
 0x25e   :  { %v184_v43 = vadd.f32 1e-05, %v183_v42 }
 0x260   :  { %373 = vrsqrt.f32 %v184_v43 }
 0x263   :  { %v190_v45 = vpop.permute.xlu0 %189 }
 0x26d   :  { %v374_v44 = vpop.eup %373 }
 0x26e   :  { %v186_v46 = vmul.f32 %v374_v44, %v178_v37 }
 0x270   :  { %v192_v47 = vmul.f32 %v190_v45, %v186_v46 }
 0x272   :  { %v198_v49 = vadd.f32 %v196_v48, %v192_v47 }
 0x274   :  { %v199_v50 = vmax.f32 %v198_v49, 0.0 }
 0x276   :  { %211 = vrot.lane.b32.xlu1 %v199_v50, %s399_s15 }
 0x27a   :  { %205 = vrot.lane.b32.xlu1 %v199_v50, %s402_s18 }
 0x27e   :  { %218 = vperm.xlu1 %371, %v201_v51  }
 0x2e8   :  { %v212_v52 = vpop.permute.xlu1 %211 }
 0x2e9   :  { %v214_v53 = vsel %vm72_vm11, %v212_v52, 0.0 }
 0x2ea   :  { %357 = vmatpush3.msk.msra.mxu1 %vm479_vm12, %v214_v53 }
 0x2eb   :  { %358 = vmatprep.subr.mxu1 %v401_v3 }
 0x2ec   :  { %359 = vmatpush3.msk.msra.mxu1 %vm475_vm10, %v199_v50  ;;  %v206_v54 = vpop.permute.xlu1 %205 }
 0x2ed   :  { %v208_v56 = vsel %vm46_vm14, 0.0, %v206_v54  ;;  %360 = vmatprep.subr.mxu1 %v401_v3 }
 0x2ee   :  { %361 = vmatpush3.msk.msra.mxu1 %vm488_vm15, %v208_v56 }
 0x2ef   :  { %363 = vmatmul.mubr.msk.f32.vlgmr.msra.gmra.mxu1 %vm221_vm2, %v200_v55 }
 0x2f9   :  { %v219_v57 = vpop.permute.xlu1 %218 }
 0x3af   :  { %v291_v58 = vpop.f32.mrf.mxu1 }
 0x3b0   :  { %v292_v59 = vadd.f32 %v291_v58, %v219_v57 }
 0x3b1   :  { %v364_v60 = vpop.f32.mrf.mxu1 }
 0x3b2   :  { %v295_v61 = vsel %vm172_vm1, %v292_v59, 0.0 }
 0x3b3   :  { %296 = vadd.xlane.f32.xlu1 %v295_v61 }
 0x3c4   :  { %310 = vperm.xlu1 %371, %v202_v62  }
 0x43c   :  { %v297_v63 = vpop.xlane.xlu1 %296 }
 0x43d   :  { %v298_v0 = vmul.f32 0.03125, %v297_v63 }
 0x43f   :  { %v299_v1 = vsub.f32 %v292_v59, %v298_v0 }
 0x440   :  { %v311_v10 = vpop.permute.xlu1 %310 }
 0x441   :  { %v300_v2 = vmul.f32 %v299_v1, %v299_v1 }
 0x443   :  { %v301_v3 = vsel %vm172_vm1, %v300_v2, 0.0 }
 0x444   :  { %302 = vadd.xlane.f32.xlu0 %v301_v3 }
 0x45a   :  { %316 = vperm.xlu0 %372, %v203_v4  }
 0x4cd   :  { %v303_v5 = vpop.xlane.xlu0 %302 }
 0x4ce   :  { %v304_v6 = vmul.f32 0.03125, %v303_v5 }
 0x4d0   :  { %v305_v7 = vadd.f32 1e-05, %v304_v6 }
 0x4d2   :  { %375 = vrsqrt.f32 %v305_v7 }
 0x4d5   :  { %v317_v12 = vpop.permute.xlu0 %316 }
 0x4df   :  { %v376_v8 = vpop.eup %375 }
 0x4e0   :  { %v307_v9 = vmul.f32 %v376_v8, %v299_v1 }
 0x4e2   :  { %v313_v11 = vmul.f32 %v311_v10, %v307_v9 }
 0x4e4   :  { %v319_v13 = vadd.f32 %v317_v12, %v313_v11 }
 0x4e6   :  { %v320_v14 = vmax.f32 %v319_v13, 0.0 }
 0x4e8   :  { %321 = vst.msk [vmem:[#allocation2] sm:$0xff] %vm172_vm1, %v320_v14 }
 0x4e9   :  { %388 = shalt.err (!%p385_p4)
}
 0x4ea   :  { %331 = dma.vmem_to_hbm [thread:$0]  %s329_s27, 128, %s547_s10, [#allocation3]  }
 0x4eb   :  { %397 = dma.done.wait [#allocation3], 128  }
 0x4ec   :  { %398 = vsyncadd [#allocation3], 4294967168 }
 0x4ed   :  { %335 = vsyncpa [#allocation3], 1 }

</bundles_post_ra>
